<compile_context>
chip_gen: v5e
topology: v5e:2x2
jax: 0.10.0
libtpu: 0.0.40
codegen_flags: <defaults>
</compile_context>

<pallas_src>
import functools

import jax
import jax.numpy as jnp
from jax.experimental import pallas as pl
from jax.experimental.pallas import tpu as pltpu


def _round_up(n, m):
    return ((n + m - 1) // m) * m


def mlp_kernel(x_ref, w1_ref, b1_ref, w2_ref, b2_ref, o_ref):
    # Layer 1 on the MXU: bf16 x bf16 -> f32 accumulator.
    h = jnp.dot(x_ref[...], w1_ref[...], preferred_element_type=jnp.float32)
    # Bias add + ReLU in f32 on the VPU; bias broadcasts (1, Hp) -> (tb, Hp).
    h = jnp.maximum(h + b1_ref[...], 0.0)
    # Layer 2 on the MXU: downcast the activation to bf16 just before matmul.
    out = jnp.dot(h.astype(jnp.bfloat16), w2_ref[...],
                  preferred_element_type=jnp.float32)
    o_ref[...] = (out + b2_ref[...]).astype(o_ref.dtype)


def prepare_mlp_params(w1, b1, w2, b2):
    """One-time parameter prep (do NOT redo per forward call).

    Takes PyTorch nn.Linear layout: w1 (H, D_in), b1 (H,), w2 (D_out, H),
    b2 (D_out,).  Returns weights pre-transposed to (in, out), cast to bf16
    and zero-padded so every lane dim is a multiple of 128.  Zero padding is
    exactly neutral through both matmuls and the ReLU.
    """
    w1 = jnp.asarray(w1, jnp.float32)
    b1 = jnp.asarray(b1, jnp.float32).reshape(-1)
    w2 = jnp.asarray(w2, jnp.float32)
    b2 = jnp.asarray(b2, jnp.float32).reshape(-1)

    H, D_in = w1.shape
    D_out, H2 = w2.shape
    assert H == H2 and b1.shape == (H,) and b2.shape == (D_out,)

    Din_p = _round_up(D_in, 128)
    Hp = _round_up(H, 128)
    Dp = _round_up(D_out, 128)

    w1p = jnp.zeros((Din_p, Hp), jnp.bfloat16).at[:D_in, :H].set(
        w1.T.astype(jnp.bfloat16))
    b1p = jnp.zeros((1, Hp), jnp.float32).at[0, :H].set(b1)
    w2p = jnp.zeros((Hp, Dp), jnp.bfloat16).at[:H, :D_out].set(
        w2.T.astype(jnp.bfloat16))
    b2p = jnp.zeros((1, Dp), jnp.float32).at[0, :D_out].set(b2)

    return dict(w1p=w1p, b1p=b1p, w2p=w2p, b2p=b2p,
                D_in=D_in, H=H, D_out=D_out)


@functools.lru_cache(maxsize=None)
def _build_mlp_call(tb, Bp, Din_p, Hp, Dp, out_dtype, single_buffer_weights,
                    vmem_limit, flops, bytes_accessed):
    if single_buffer_weights:
        # Grid-invariant operands: one VMEM buffer (default 2 is pure waste).
        wmode = dict(pipeline_mode=pl.Buffered(1))
    else:
        wmode = {}
    in_specs = [
        # Batch-tiled activations: double-buffered HBM->VMEM per grid step.
        pl.BlockSpec((tb, Din_p), lambda i: (i, 0)),
        # Weights & biases: same block every step -> VMEM-resident.
        pl.BlockSpec((Din_p, Hp), lambda i: (0, 0), **wmode),
        pl.BlockSpec((1, Hp), lambda i: (0, 0), **wmode),
        pl.BlockSpec((Hp, Dp), lambda i: (0, 0), **wmode),
        pl.BlockSpec((1, Dp), lambda i: (0, 0), **wmode),
    ]
    return pl.pallas_call(
        mlp_kernel,
        out_shape=jax.ShapeDtypeStruct((Bp, Dp), out_dtype),
        grid_spec=pltpu.PrefetchScalarGridSpec(
            num_scalar_prefetch=0,
            grid=(Bp // tb,),
            in_specs=in_specs,
            out_specs=pl.BlockSpec((tb, Dp), lambda i: (i, 0)),
        ),
        compiler_params=pltpu.CompilerParams(
            # Batch blocks are independent -> shard across TCs on v7x.
            dimension_semantics=("parallel",),
            vmem_limit_bytes=vmem_limit,
        ),
        cost_estimate=pl.CostEstimate(
            flops=flops, transcendentals=0, bytes_accessed=bytes_accessed),
    )


_SINGLE_BUFFER_WEIGHTS = True  # flipped off once if this build rejects Buffered(1)


def mlp_forward(x, params, *, max_tb=256, out_dtype=jnp.bfloat16):
    """relu(x @ W1.T + b1) @ W2.T + b2 in one fused Pallas kernel.

    `params` comes from prepare_mlp_params().  max_tb=256 fills the 256-wide
    MXU on v6e/v7x and keeps the VMEM plan inside v7x's 64 MiB; on v5e/v6e
    (128 MiB VMEM) it may be raised to 512 for very large batches.
    """
    global _SINGLE_BUFFER_WEIGHTS

    w1p, b1p, w2p, b2p = params["w1p"], params["b1p"], params["w2p"], params["b2p"]
    D_in, H, D_out = params["D_in"], params["H"], params["D_out"]
    Din_p, Hp = w1p.shape
    Dp = w2p.shape[1]

    B = x.shape[0]
    assert x.shape[1] == D_in, f"expected x with {D_in} features, got {x.shape}"
    assert max_tb % 16 == 0

    # Batch tiling: pad only to the bf16 sublane requirement (16) for small B;
    # use max_tb-row tiles (several grid steps) for large B.
    b16 = _round_up(max(B, 1), 16)
    tb = b16 if b16 <= max_tb else max_tb
    Bp = _round_up(B, tb)
    # TODO(synk): for tiny B on v7x the grid collapses to 1 step; splitting
    # D_out into >=2 parallel blocks would keep the second TensorCore busy.

    # Pad/cast the activations only if needed (accepts bf16 x end-to-end).
    if x.dtype == jnp.bfloat16 and (B, x.shape[1]) == (Bp, Din_p):
        xp = x
    else:
        xp = jnp.zeros((Bp, Din_p), jnp.bfloat16).at[:B, :D_in].set(
            x.astype(jnp.bfloat16))

    out_itemsize = jnp.dtype(out_dtype).itemsize
    flops = 2 * Bp * (Din_p * Hp + Hp * Dp)
    bytes_accessed = (xp.size * 2 + w1p.size * 2 + w2p.size * 2
                      + b1p.size * 4 + b2p.size * 4 + Bp * Dp * out_itemsize)

    # VMEM plan (conservatively assuming double-buffered weights) + headroom,
    # capped at 56 MiB so it stays inside v7x's 64 MiB/TC VMEM.
    weight_bytes = (Din_p * Hp + Hp * Dp) * 2 + (Hp + Dp) * 4
    stream_bytes = 2 * tb * Din_p * 2 + 2 * tb * Dp * out_itemsize
    interm_bytes = tb * Hp * (4 + 2)  # f32 hidden activation + its bf16 copy
    vmem_limit = int(min(56 << 20,
                         max(32 << 20,
                             2 * weight_bytes + stream_bytes + interm_bytes
                             + (8 << 20))))
    # TODO(synk): for hidden/output widths whose bf16 weights exceed this
    # budget, add grid axes over H / D_out ("arbitrary" with an f32 accumulator
    # scratch and pl.when init/finalize) instead of keeping both weight
    # matrices fully VMEM-resident.

    def run(single_buffer):
        call = _build_mlp_call(tb, Bp, Din_p, Hp, Dp, out_dtype, single_buffer,
                               vmem_limit, flops, bytes_accessed)
        return call(xp, w1p, b1p, w2p, b2p)

    if _SINGLE_BUFFER_WEIGHTS:
        try:
            out_p = run(True)
        except Exception:
            # This JAX build rejects single-buffered grid-invariant inputs;
            # fall back to default double buffering (correctness unchanged).
            _SINGLE_BUFFER_WEIGHTS = False
            out_p = run(False)
    else:
        out_p = run(False)

    # Strip batch / lane padding.
    return out_p[:B, :D_out]


if __name__ == "__main__":
    # Shapes implied by MLP(input_layer, hidden_layer, output_layer, ...).
    batch, d_in, d_hidden, d_out = 8, 32, 64, 10

    key = jax.random.PRNGKey(0)
    kx, kw1, kb1, kw2, kb2 = jax.random.split(key, 5)

    x = jax.random.normal(kx, (batch, d_in), dtype=jnp.float32)
    # PyTorch nn.Linear layout: weight (out_features, in_features), bias (out,).
    w1 = jax.random.normal(kw1, (d_hidden, d_in), dtype=jnp.float32) * 0.1
    b1 = jax.random.normal(kb1, (d_hidden,), dtype=jnp.float32) * 0.1
    w2 = jax.random.normal(kw2, (d_out, d_hidden), dtype=jnp.float32) * 0.1
    b2 = jax.random.normal(kb2, (d_out,), dtype=jnp.float32) * 0.1

    # One-time param prep (padding + bf16 cast hoisted out of the forward).
    params = prepare_mlp_params(w1, b1, w2, b2)

    out = mlp_forward(x, params)
    out = jax.block_until_ready(out)
    assert out.shape == (batch, d_out)
    assert out.dtype == jnp.bfloat16
    out_f32 = out.astype(jnp.float32)

    # Reference with matching bf16 operand rounding (f32 accumulation).
    xb = x.astype(jnp.bfloat16).astype(jnp.float32)
    w1b = w1.astype(jnp.bfloat16).astype(jnp.float32)
    w2b = w2.astype(jnp.bfloat16).astype(jnp.float32)
    h_ref = jnp.maximum(xb @ w1b.T + b1, 0.0)
    ref = h_ref.astype(jnp.bfloat16).astype(jnp.float32) @ w2b.T + b2
    ref_bf16 = ref.astype(jnp.bfloat16).astype(jnp.float32)
    assert jnp.allclose(out_f32, ref_bf16, atol=1e-2, rtol=1e-2), \
        "mismatch vs bf16-rounded reference"

    # Loose check against the full-f32 reference (bf16 quantization noise).
    ref_f32 = jnp.maximum(x @ w1.T + b1, 0.0) @ w2.T + b2
    assert jnp.allclose(out_f32, ref_f32, atol=5e-2, rtol=5e-2), \
        "mismatch vs f32 reference"

    print("KERNEL_OK")
</pallas_src>

<mosaic_0001>
module attributes {stable_mosaic.version = 11 : i64} {
  func.func @mlp_kernel(%arg0: i32, %arg1: memref<16x128xbf16, #tpu.memory_space<vmem>>, %arg2: memref<128x128xbf16, #tpu.memory_space<vmem>>, %arg3: memref<1x128xf32, #tpu.memory_space<vmem>>, %arg4: memref<128x128xbf16, #tpu.memory_space<vmem>>, %arg5: memref<1x128xf32, #tpu.memory_space<vmem>>, %arg6: memref<16x128xbf16, #tpu.memory_space<vmem>>) attributes {dimension_semantics = [#tpu.dimension_semantics<parallel>], iteration_bounds = array<i64: 1>, scalar_prefetch = 0 : i64, scratch_operands = 0 : i64, tpu.core_type = #tpu.core_type<tc>, window_params = [{transform_indices = @transform_0, window_bounds = array<i64: 16, 128>}, {pipeline_mode = #tpu.pipeline_mode<synchronous>, transform_indices = @transform_1, window_bounds = array<i64: 128, 128>}, {pipeline_mode = #tpu.pipeline_mode<synchronous>, transform_indices = @transform_2, window_bounds = array<i64: 1, 128>}, {pipeline_mode = #tpu.pipeline_mode<synchronous>, transform_indices = @transform_3, window_bounds = array<i64: 128, 128>}, {pipeline_mode = #tpu.pipeline_mode<synchronous>, transform_indices = @transform_4, window_bounds = array<i64: 1, 128>}, {transform_indices = @transform_5, window_bounds = array<i64: 16, 128>}]} {
    %c0 = arith.constant 0 : index
    %c0_0 = arith.constant 0 : index
    %0 = vector.load %arg1[%c0, %c0_0] : memref<16x128xbf16, #tpu.memory_space<vmem>>, vector<16x128xbf16>
    %c0_1 = arith.constant 0 : index
    %c0_2 = arith.constant 0 : index
    %1 = vector.load %arg2[%c0_1, %c0_2] : memref<128x128xbf16, #tpu.memory_space<vmem>>, vector<128x128xbf16>
    %cst = arith.constant dense<0.000000e+00> : vector<16x128xf32>
    %2 = tpu.matmul %0, %1, %cst {dimension_numbers = #tpu.dot_dimension_numbers<[1], [0], [0], [1], [0, 0, 1, 1], [], []>} : vector<16x128xbf16>, vector<128x128xbf16>, vector<16x128xf32> -> vector<16x128xf32>
    %c0_3 = arith.constant 0 : index
    %c0_4 = arith.constant 0 : index
    %3 = vector.load %arg3[%c0_3, %c0_4] : memref<1x128xf32, #tpu.memory_space<vmem>>, vector<1x128xf32>
    %4 = vector.broadcast %3 : vector<1x128xf32> to vector<16x128xf32>
    %5 = arith.addf %2, %4 : vector<16x128xf32>
    %cst_5 = arith.constant 0.000000e+00 : f32
    %6 = vector.broadcast %cst_5 : f32 to vector<16x128xf32>
    %7 = arith.maximumf %5, %6 : vector<16x128xf32>
    %8 = arith.truncf %7 : vector<16x128xf32> to vector<16x128xbf16>
    %c0_6 = arith.constant 0 : index
    %c0_7 = arith.constant 0 : index
    %9 = vector.load %arg4[%c0_6, %c0_7] : memref<128x128xbf16, #tpu.memory_space<vmem>>, vector<128x128xbf16>
    %cst_8 = arith.constant dense<0.000000e+00> : vector<16x128xf32>
    %10 = tpu.matmul %8, %9, %cst_8 {dimension_numbers = #tpu.dot_dimension_numbers<[1], [0], [0], [1], [0, 0, 1, 1], [], []>} : vector<16x128xbf16>, vector<128x128xbf16>, vector<16x128xf32> -> vector<16x128xf32>
    %c0_9 = arith.constant 0 : index
    %c0_10 = arith.constant 0 : index
    %11 = vector.load %arg5[%c0_9, %c0_10] : memref<1x128xf32, #tpu.memory_space<vmem>>, vector<1x128xf32>
    %12 = vector.broadcast %11 : vector<1x128xf32> to vector<16x128xf32>
    %13 = arith.addf %10, %12 : vector<16x128xf32>
    %14 = arith.truncf %13 : vector<16x128xf32> to vector<16x128xbf16>
    %c0_11 = arith.constant 0 : index
    %c0_12 = arith.constant 0 : index
    %15 = vector.load %arg6[%c0_11, %c0_12] : memref<16x128xbf16, #tpu.memory_space<vmem>>, vector<16x128xbf16>
    tpu.vector_store %arg6[%c0_11, %c0_12], %14 {strides = array<i32>} : memref<16x128xbf16, #tpu.memory_space<vmem>>, vector<16x128xbf16>,
    return
  }
  func.func @transform_0(%arg0: i32) -> (i32, i32) {
    %c0_i32 = arith.constant 0 : i32
    %c0_i32_0 = arith.constant 0 : i32
    return %arg0, %c0_i32 : i32, i32
  }
  func.func @transform_1(%arg0: i32) -> (i32, i32) {
    %c0_i32 = arith.constant 0 : i32
    %c0_i32_0 = arith.constant 0 : i32
    %c0_i32_1 = arith.constant 0 : i32
    return %c0_i32, %c0_i32_0 : i32, i32
  }
  func.func @transform_2(%arg0: i32) -> (i32, i32) {
    %c0_i32 = arith.constant 0 : i32
    %c0_i32_0 = arith.constant 0 : i32
    %c0_i32_1 = arith.constant 0 : i32
    return %c0_i32, %c0_i32_0 : i32, i32
  }
  func.func @transform_3(%arg0: i32) -> (i32, i32) {
    %c0_i32 = arith.constant 0 : i32
    %c0_i32_0 = arith.constant 0 : i32
    %c0_i32_1 = arith.constant 0 : i32
    return %c0_i32, %c0_i32_0 : i32, i32
  }
  func.func @transform_4(%arg0: i32) -> (i32, i32) {
    %c0_i32 = arith.constant 0 : i32
    %c0_i32_0 = arith.constant 0 : i32
    %c0_i32_1 = arith.constant 0 : i32
    return %c0_i32, %c0_i32_0 : i32, i32
  }
  func.func @transform_5(%arg0: i32) -> (i32, i32) {
    %c0_i32 = arith.constant 0 : i32
    %c0_i32_0 = arith.constant 0 : i32
    return %arg0, %c0_i32 : i32, i32
  }
}

module attributes {stable_mosaic.version = 11 : i64} {
  func.func @mlp_kernel(%arg0: i32, %arg1: memref<16x128xbf16, #tpu.memory_space<vmem>>, %arg2: memref<128x128xbf16, #tpu.memory_space<vmem>>, %arg3: memref<1x128xf32, #tpu.memory_space<vmem>>, %arg4: memref<128x128xbf16, #tpu.memory_space<vmem>>, %arg5: memref<1x128xf32, #tpu.memory_space<vmem>>, %arg6: memref<16x128xbf16, #tpu.memory_space<vmem>>) attributes {dimension_semantics = [#tpu.dimension_semantics<parallel>], iteration_bounds = array<i64: 1>, scalar_prefetch = 0 : i64, scratch_operands = 0 : i64, tpu.core_type = #tpu.core_type<tc>, window_params = [{transform_indices = @transform_0, window_bounds = array<i64: 16, 128>}, {pipeline_mode = #tpu.pipeline_mode<synchronous>, transform_indices = @transform_1, window_bounds = array<i64: 128, 128>}, {pipeline_mode = #tpu.pipeline_mode<synchronous>, transform_indices = @transform_2, window_bounds = array<i64: 1, 128>}, {pipeline_mode = #tpu.pipeline_mode<synchronous>, transform_indices = @transform_3, window_bounds = array<i64: 128, 128>}, {pipeline_mode = #tpu.pipeline_mode<synchronous>, transform_indices = @transform_4, window_bounds = array<i64: 1, 128>}, {transform_indices = @transform_5, window_bounds = array<i64: 16, 128>}]} {
    %c0 = arith.constant 0 : index
    %c0_0 = arith.constant 0 : index
    %0 = vector.load %arg1[%c0, %c0_0] : memref<16x128xbf16, #tpu.memory_space<vmem>>, vector<16x128xbf16>
    %c0_1 = arith.constant 0 : index
    %c0_2 = arith.constant 0 : index
    %1 = vector.load %arg2[%c0_1, %c0_2] : memref<128x128xbf16, #tpu.memory_space<vmem>>, vector<128x128xbf16>
    %cst = arith.constant dense<0.000000e+00> : vector<16x128xf32>
    %2 = tpu.matmul %0, %1, %cst {dimension_numbers = #tpu.dot_dimension_numbers<[1], [0], [0], [1], [0, 0, 1, 1], [], []>} : vector<16x128xbf16>, vector<128x128xbf16>, vector<16x128xf32> -> vector<16x128xf32>
    %c0_3 = arith.constant 0 : index
    %c0_4 = arith.constant 0 : index
    %3 = vector.load %arg3[%c0_3, %c0_4] : memref<1x128xf32, #tpu.memory_space<vmem>>, vector<1x128xf32>
    %4 = vector.broadcast %3 : vector<1x128xf32> to vector<16x128xf32>
    %5 = arith.addf %2, %4 : vector<16x128xf32>
    %cst_5 = arith.constant 0.000000e+00 : f32
    %6 = vector.broadcast %cst_5 : f32 to vector<16x128xf32>
    %7 = arith.maximumf %5, %6 : vector<16x128xf32>
    %8 = arith.truncf %7 : vector<16x128xf32> to vector<16x128xbf16>
    %c0_6 = arith.constant 0 : index
    %c0_7 = arith.constant 0 : index
    %9 = vector.load %arg4[%c0_6, %c0_7] : memref<128x128xbf16, #tpu.memory_space<vmem>>, vector<128x128xbf16>
    %cst_8 = arith.constant dense<0.000000e+00> : vector<16x128xf32>
    %10 = tpu.matmul %8, %9, %cst_8 {dimension_numbers = #tpu.dot_dimension_numbers<[1], [0], [0], [1], [0, 0, 1, 1], [], []>} : vector<16x128xbf16>, vector<128x128xbf16>, vector<16x128xf32> -> vector<16x128xf32>
    %c0_9 = arith.constant 0 : index
    %c0_10 = arith.constant 0 : index
    %11 = vector.load %arg5[%c0_9, %c0_10] : memref<1x128xf32, #tpu.memory_space<vmem>>, vector<1x128xf32>
    %12 = vector.broadcast %11 : vector<1x128xf32> to vector<16x128xf32>
    %13 = arith.addf %10, %12 : vector<16x128xf32>
    %14 = arith.truncf %13 : vector<16x128xf32> to vector<16x128xbf16>
    %c0_11 = arith.constant 0 : index
    %c0_12 = arith.constant 0 : index
    %15 = vector.load %arg6[%c0_11, %c0_12] : memref<16x128xbf16, #tpu.memory_space<vmem>>, vector<16x128xbf16>
    tpu.vector_store %arg6[%c0_11, %c0_12], %14 {strides = array<i32>} : memref<16x128xbf16, #tpu.memory_space<vmem>>, vector<16x128xbf16>,
    return
  }
  func.func @transform_0(%arg0: i32) -> (i32, i32) {
    %c0_i32 = arith.constant 0 : i32
    %c0_i32_0 = arith.constant 0 : i32
    return %arg0, %c0_i32 : i32, i32
  }
  func.func @transform_1(%arg0: i32) -> (i32, i32) {
    %c0_i32 = arith.constant 0 : i32
    %c0_i32_0 = arith.constant 0 : i32
    %c0_i32_1 = arith.constant 0 : i32
    return %c0_i32, %c0_i32_0 : i32, i32
  }
  func.func @transform_2(%arg0: i32) -> (i32, i32) {
    %c0_i32 = arith.constant 0 : i32
    %c0_i32_0 = arith.constant 0 : i32
    %c0_i32_1 = arith.constant 0 : i32
    return %c0_i32, %c0_i32_0 : i32, i32
  }
  func.func @transform_3(%arg0: i32) -> (i32, i32) {
    %c0_i32 = arith.constant 0 : i32
    %c0_i32_0 = arith.constant 0 : i32
    %c0_i32_1 = arith.constant 0 : i32
    return %c0_i32, %c0_i32_0 : i32, i32
  }
  func.func @transform_4(%arg0: i32) -> (i32, i32) {
    %c0_i32 = arith.constant 0 : i32
    %c0_i32_0 = arith.constant 0 : i32
    %c0_i32_1 = arith.constant 0 : i32
    return %c0_i32, %c0_i32_0 : i32, i32
  }
  func.func @transform_5(%arg0: i32) -> (i32, i32) {
    %c0_i32 = arith.constant 0 : i32
    %c0_i32_0 = arith.constant 0 : i32
    return %arg0, %c0_i32 : i32, i32
  }
}

</mosaic_0001>

<bundles_post_ra>
// kernel: tpu_custom_call.1
= control target key start
LH: loop header
LB: loop body
LE: loop exit
PB: predicated region body
PF: predicated region fallthrough
CT: control target
= control target key end

     0   :  { %10 = vsyncpa [#allocation3], 0  ;;  %s533_s0 = inlined_call_operand.hbm [shape: bf16[16,128], index: 0, kind: input, shape index: {}]   ;;  %s534_s1 = inlined_call_operand.hbm [shape: bf16[128,128], index: 1, kind: input, shape index: {}]   ;;  %s535_s2 = inlined_call_operand.vmem [shape: f32[1,128], index: 2, kind: input, shape index: {}]   ;;  %s536_s3 = inlined_call_operand.hbm [shape: bf16[128,128], index: 3, kind: input, shape index: {}]   ;;  %s537_s4 = inlined_call_operand.vmem [shape: f32[1,128], index: 4, kind: input, shape index: {}]   ;;  %s538_s5 = inlined_call_operand.hbm [shape: bf16[16,128], index: 5, kind: output, shape index: {}]  }
   0x1   :  { %11 = vsyncpa [#allocation6], 0 }
   0x2   :  { %12 = vsyncpa [#allocation4], 0  ;;  %s30_s20 = sshll.u32 %s534_s1, 4  ;;  %s467_s21 = smov [#allocation5]   ;;  %s31_s20 = int_to_ptr.hbm [resolvable:$true] %s30_s20 }
   0x3   :  { %s32_s22 = sshll.u32 %s467_s21, 4  ;;  %s17_s25 = sshll.u32 %s533_s0, 4  ;;  %s33_s22 = int_to_ptr.vmem [resolvable:$true] %s32_s22  ;;  %s18_s25 = int_to_ptr.hbm [resolvable:$true] %s17_s25 }
   0x4   :  { %s468_s26 = smov 64   ;;  %s469_s27 = smov 4  }
   0x5   :  { %38 = dma.hbm_to_vmem [thread:$0]  %s31_s20, 1024, %s33_s22, [#allocation6], %s468_s26, %s468_s26, %s469_s27  }
   0x6   :  { %s470_s28 = smov [#allocation2]   ;;  %s45_s1 = sshll.u32 %s536_s3, 4  ;;  %s46_s1 = int_to_ptr.hbm [resolvable:$true] %s45_s1 }
   0x7   :  { %s19_s29 = sshll.u32 %s470_s28, 4  ;;  %s471_s0 = smov [#allocation7]   ;;  %s20_s29 = int_to_ptr.vmem [resolvable:$true] %s19_s29 }
   0x8   :  { %25 = dma.hbm_to_vmem [thread:$0]  %s18_s25, 128, %s20_s29, [#allocation3], %s468_s26, %s468_s26, %s469_s27  }
   0x9   :  { %s47_s7 = sshll.u32 %s471_s0, 4  ;;  %s48_s7 = int_to_ptr.vmem [resolvable:$true] %s47_s7 }
   0xa   :  { %53 = dma.hbm_to_vmem [thread:$0]  %s46_s1, 1024, %s48_s7, [#allocation6], %s468_s26, %s468_s26, %s469_s27  }
   0xb   :  { %461 = dma.done.wait [#allocation3], 128  }
   0xc   :  { %462 = vsyncadd [#allocation3], 4294967168 }
   0xd   :  { %463 = dma.done.wait [#allocation6], 2048  }
   0xe   :  { %464 = vsyncadd [#allocation6], 4294965248  ;;  %v343_v0 = vld [vmem:[#allocation5 + $0x38] sm:$0xff]  ;;  %v342_v1 = vld [vmem:[#allocation5 + $0x30] sm:$0xff]  ;;  %s472_s11 = smov [#allocation8]   ;;  %s253_s15 = sshll.u32 %s538_s5, 4  ;;  %s254_s15 = int_to_ptr.hbm [resolvable:$true] %s253_s15 }
   0xf   :  { %144 = vmatpush.bf16.msra.mxu0 %v343_v0  ;;  %v351_v2 = vld [vmem:[#allocation7 + $0x38] sm:$0xff]  ;;  %v350_v3 = vld [vmem:[#allocation7 + $0x30] sm:$0xff]  ;;  %v341_v4 = vld [vmem:[#allocation5 + $0x28] sm:$0xff]  ;;  %s251_s12 = sshll.u32 %s472_s11, 4  ;;  %s252_s12 = int_to_ptr.vmem [resolvable:$true] %s251_s12 }
  0x10   :  { %229 = vmatpush.bf16.msra.mxu1 %v351_v2  ;;  %v349_v5 = vld [vmem:[#allocation7 + $0x28] sm:$0xff]  ;;  %v340_v6 = vld [vmem:[#allocation5 + $0x20] sm:$0xff]  ;;  %v339_v8 = vld [vmem:[#allocation5 + $0x18] sm:$0xff] }
  0x11   :  { %v348_v7 = vld [vmem:[#allocation7 + $0x20] sm:$0xff]  ;;  %v338_v9 = vld [vmem:[#allocation5 + $0x10] sm:$0xff]  ;;  %v337_v10 = vld [vmem:[#allocation5 + $0x8] sm:$0xff] }
  0x12   :  { %v336_v11 = vld [vmem:[#allocation5] sm:$0xff]  ;;  %v335_v12 = vld [vmem:[#allocation2] sm:$0xff]  ;;  %v346_v14 = vld [vmem:[#allocation7 + $0x10] sm:$0xff] }
  0x13   :  { %145 = vmatpush.bf16.msra.mxu0 %v342_v1  ;;  %v347_v13 = vld [vmem:[#allocation7 + $0x18] sm:$0xff]  ;;  %v345_v15 = vld [vmem:[#allocation7 + $0x8] sm:$0xff]  ;;  %v344_v16 = vld [vmem:[#allocation7] sm:$0xff] }
  0x14   :  { %230 = vmatpush.bf16.msra.mxu1 %v350_v3  ;;  %v363_v18 = vld [vmem:[%s535_s2] ss:$0 sm:$0xff] }
  0x15   :  { %v364_v26 = vld [vmem:[%s537_s4] ss:$0 sm:$0xff] }
  0x17   :  { %146 = vmatpush.bf16.msra.mxu0 %v341_v4 }
  0x18   :  { %231 = vmatpush.bf16.msra.mxu1 %v349_v5 }
  0x1b   :  { %147 = vmatpush.bf16.msra.mxu0 %v340_v6 }
  0x1c   :  { %232 = vmatpush.bf16.msra.mxu1 %v348_v7 }
  0x1f   :  { %148 = vmatpush.bf16.msra.mxu0 %v339_v8 }
  0x20   :  { %233 = vmatpush.bf16.msra.mxu1 %v347_v13 }
  0x23   :  { %149 = vmatpush.bf16.msra.mxu0 %v338_v9 }
  0x24   :  { %234 = vmatpush.bf16.msra.mxu1 %v346_v14 }
  0x27   :  { %150 = vmatpush.bf16.msra.mxu0 %v337_v10 }
  0x28   :  { %235 = vmatpush.bf16.msra.mxu1 %v345_v15 }
  0x2b   :  { %151 = vmatpush.bf16.msra.mxu0 %v336_v11 }
  0x2c   :  { %236 = vmatpush.bf16.msra.mxu1 %v344_v16 }
  0x2e   :  { %152 = vmatmul.bf16.vlgmr.msra.gmra.mxu0 %v335_v12 }
  0xab   :  { %v153_v17 = vpop.f32.mrf.mxu0 }
  0xac   :  { %v154_v19 = vadd.f32 %v363_v18, %v153_v17 }
  0xae   :  { %v158_v22 = vmax.f32 %v154_v19, 0.0 }
  0xb3   :  { %v155_v20 = vpop.f32.mrf.mxu0 }
  0xb4   :  { %v156_v21 = vadd.f32 %v363_v18, %v155_v20 }
  0xb6   :  { %v159_v23 = vmax.f32 %v156_v21, 0.0 }
  0xb8   :  { %v160_v24 = vpack.c.bf16 %v159_v23, %v158_v22 }
  0xba   :  { %237 = vmatmul.bf16.vlgmr.msra.gmra.mxu1 %v160_v24 }
 0x137   :  { %v238_v25 = vpop.f32.mrf.mxu1 }
 0x138   :  { %v239_v28 = vadd.f32 %v364_v26, %v238_v25 }
 0x13f   :  { %v240_v27 = vpop.f32.mrf.mxu1 }
 0x140   :  { %v241_v29 = vadd.f32 %v364_v26, %v240_v27 }
 0x142   :  { %v355_v30 = vpack.c.bf16 %v241_v29, %v239_v28 }
 0x144   :  { %356 = vst [vmem:[#allocation8] sm:$0xff] %v355_v30  }
 0x145   :  { %259 = dma.vmem_to_hbm [thread:$0]  %s252_s12, 128, %s254_s15, [#allocation4], %s468_s26, %s468_s26, %s469_s27  }
 0x146   :  { %465 = dma.done.wait [#allocation4], 128  }
 0x147   :  { %466 = vsyncadd [#allocation4], 4294967168 }
 0x148   :  { %264 = vsyncpa [#allocation3], 1 }
 0x149   :  { %265 = vsyncpa [#allocation6], 1 }
 0x14a   :  { %266 = vsyncpa [#allocation4], 1 }

// kernel: tpu_custom_call.1
= control target key start
LH: loop header
LB: loop body
LE: loop exit
PB: predicated region body
PF: predicated region fallthrough
CT: control target
= control target key end

     0   :  { %10 = vsyncpa [#allocation3], 0  ;;  %s533_s0 = inlined_call_operand.hbm [shape: bf16[16,128], index: 0, kind: input, shape index: {}]   ;;  %s534_s1 = inlined_call_operand.hbm [shape: bf16[128,128], index: 1, kind: input, shape index: {}]   ;;  %s535_s2 = inlined_call_operand.vmem [shape: f32[1,128], index: 2, kind: input, shape index: {}]   ;;  %s536_s3 = inlined_call_operand.hbm [shape: bf16[128,128], index: 3, kind: input, shape index: {}]   ;;  %s537_s4 = inlined_call_operand.vmem [shape: f32[1,128], index: 4, kind: input, shape index: {}]   ;;  %s538_s5 = inlined_call_operand.hbm [shape: bf16[16,128], index: 5, kind: output, shape index: {}]  }
   0x1   :  { %11 = vsyncpa [#allocation6], 0 }
   0x2   :  { %12 = vsyncpa [#allocation4], 0  ;;  %s30_s20 = sshll.u32 %s534_s1, 4  ;;  %s467_s21 = smov [#allocation5]   ;;  %s31_s20 = int_to_ptr.hbm [resolvable:$true] %s30_s20 }
   0x3   :  { %s32_s22 = sshll.u32 %s467_s21, 4  ;;  %s17_s25 = sshll.u32 %s533_s0, 4  ;;  %s33_s22 = int_to_ptr.vmem [resolvable:$true] %s32_s22  ;;  %s18_s25 = int_to_ptr.hbm [resolvable:$true] %s17_s25 }
   0x4   :  { %s468_s26 = smov 64   ;;  %s469_s27 = smov 4  }
   0x5   :  { %38 = dma.hbm_to_vmem [thread:$0]  %s31_s20, 1024, %s33_s22, [#allocation6], %s468_s26, %s468_s26, %s469_s27  }
   0x6   :  { %s470_s28 = smov [#allocation2]   ;;  %s45_s1 = sshll.u32 %s536_s3, 4  ;;  %s46_s1 = int_to_ptr.hbm [resolvable:$true] %s45_s1 }
   0x7   :  { %s19_s29 = sshll.u32 %s470_s28, 4  ;;  %s471_s0 = smov [#allocation7]   ;;  %s20_s29 = int_to_ptr.vmem [resolvable:$true] %s19_s29 }
   0x8   :  { %25 = dma.hbm_to_vmem [thread:$0]  %s18_s25, 128, %s20_s29, [#allocation3], %s468_s26, %s468_s26, %s469_s27  }
   0x9   :  { %s47_s7 = sshll.u32 %s471_s0, 4  ;;  %s48_s7 = int_to_ptr.vmem [resolvable:$true] %s47_s7 }
   0xa   :  { %53 = dma.hbm_to_vmem [thread:$0]  %s46_s1, 1024, %s48_s7, [#allocation6], %s468_s26, %s468_s26, %s469_s27  }
   0xb   :  { %461 = dma.done.wait [#allocation3], 128  }
   0xc   :  { %462 = vsyncadd [#allocation3], 4294967168 }
   0xd   :  { %463 = dma.done.wait [#allocation6], 2048  }
   0xe   :  { %464 = vsyncadd [#allocation6], 4294965248  ;;  %v343_v0 = vld [vmem:[#allocation5 + $0x38] sm:$0xff]  ;;  %v342_v1 = vld [vmem:[#allocation5 + $0x30] sm:$0xff]  ;;  %s472_s11 = smov [#allocation8]   ;;  %s253_s15 = sshll.u32 %s538_s5, 4  ;;  %s254_s15 = int_to_ptr.hbm [resolvable:$true] %s253_s15 }
   0xf   :  { %144 = vmatpush.bf16.msra.mxu0 %v343_v0  ;;  %v351_v2 = vld [vmem:[#allocation7 + $0x38] sm:$0xff]  ;;  %v350_v3 = vld [vmem:[#allocation7 + $0x30] sm:$0xff]  ;;  %v341_v4 = vld [vmem:[#allocation5 + $0x28] sm:$0xff]  ;;  %s251_s12 = sshll.u32 %s472_s11, 4  ;;  %s252_s12 = int_to_ptr.vmem [resolvable:$true] %s251_s12 }
  0x10   :  { %229 = vmatpush.bf16.msra.mxu1 %v351_v2  ;;  %v349_v5 = vld [vmem:[#allocation7 + $0x28] sm:$0xff]  ;;  %v340_v6 = vld [vmem:[#allocation5 + $0x20] sm:$0xff]  ;;  %v339_v8 = vld [vmem:[#allocation5 + $0x18] sm:$0xff] }
  0x11   :  { %v348_v7 = vld [vmem:[#allocation7 + $0x20] sm:$0xff]  ;;  %v338_v9 = vld [vmem:[#allocation5 + $0x10] sm:$0xff]  ;;  %v337_v10 = vld [vmem:[#allocation5 + $0x8] sm:$0xff] }
  0x12   :  { %v336_v11 = vld [vmem:[#allocation5] sm:$0xff]  ;;  %v335_v12 = vld [vmem:[#allocation2] sm:$0xff]  ;;  %v346_v14 = vld [vmem:[#allocation7 + $0x10] sm:$0xff] }
  0x13   :  { %145 = vmatpush.bf16.msra.mxu0 %v342_v1  ;;  %v347_v13 = vld [vmem:[#allocation7 + $0x18] sm:$0xff]  ;;  %v345_v15 = vld [vmem:[#allocation7 + $0x8] sm:$0xff]  ;;  %v344_v16 = vld [vmem:[#allocation7] sm:$0xff] }
  0x14   :  { %230 = vmatpush.bf16.msra.mxu1 %v350_v3  ;;  %v363_v18 = vld [vmem:[%s535_s2] ss:$0 sm:$0xff] }
  0x15   :  { %v364_v26 = vld [vmem:[%s537_s4] ss:$0 sm:$0xff] }
  0x17   :  { %146 = vmatpush.bf16.msra.mxu0 %v341_v4 }
  0x18   :  { %231 = vmatpush.bf16.msra.mxu1 %v349_v5 }
  0x1b   :  { %147 = vmatpush.bf16.msra.mxu0 %v340_v6 }
  0x1c   :  { %232 = vmatpush.bf16.msra.mxu1 %v348_v7 }
  0x1f   :  { %148 = vmatpush.bf16.msra.mxu0 %v339_v8 }
  0x20   :  { %233 = vmatpush.bf16.msra.mxu1 %v347_v13 }
  0x23   :  { %149 = vmatpush.bf16.msra.mxu0 %v338_v9 }
  0x24   :  { %234 = vmatpush.bf16.msra.mxu1 %v346_v14 }
  0x27   :  { %150 = vmatpush.bf16.msra.mxu0 %v337_v10 }
  0x28   :  { %235 = vmatpush.bf16.msra.mxu1 %v345_v15 }
  0x2b   :  { %151 = vmatpush.bf16.msra.mxu0 %v336_v11 }
  0x2c   :  { %236 = vmatpush.bf16.msra.mxu1 %v344_v16 }
  0x2e   :  { %152 = vmatmul.bf16.vlgmr.msra.gmra.mxu0 %v335_v12 }
  0xab   :  { %v153_v17 = vpop.f32.mrf.mxu0 }
  0xac   :  { %v154_v19 = vadd.f32 %v363_v18, %v153_v17 }
  0xae   :  { %v158_v22 = vmax.f32 %v154_v19, 0.0 }
  0xb3   :  { %v155_v20 = vpop.f32.mrf.mxu0 }
  0xb4   :  { %v156_v21 = vadd.f32 %v363_v18, %v155_v20 }
  0xb6   :  { %v159_v23 = vmax.f32 %v156_v21, 0.0 }
  0xb8   :  { %v160_v24 = vpack.c.bf16 %v159_v23, %v158_v22 }
  0xba   :  { %237 = vmatmul.bf16.vlgmr.msra.gmra.mxu1 %v160_v24 }
 0x137   :  { %v238_v25 = vpop.f32.mrf.mxu1 }
 0x138   :  { %v239_v28 = vadd.f32 %v364_v26, %v238_v25 }
 0x13f   :  { %v240_v27 = vpop.f32.mrf.mxu1 }
 0x140   :  { %v241_v29 = vadd.f32 %v364_v26, %v240_v27 }
 0x142   :  { %v355_v30 = vpack.c.bf16 %v241_v29, %v239_v28 }
 0x144   :  { %356 = vst [vmem:[#allocation8] sm:$0xff] %v355_v30  }
 0x145   :  { %259 = dma.vmem_to_hbm [thread:$0]  %s252_s12, 128, %s254_s15, [#allocation4], %s468_s26, %s468_s26, %s469_s27  }
 0x146   :  { %465 = dma.done.wait [#allocation4], 128  }
 0x147   :  { %466 = vsyncadd [#allocation4], 4294967168 }
 0x148   :  { %264 = vsyncpa [#allocation3], 1 }
 0x149   :  { %265 = vsyncpa [#allocation6], 1 }
 0x14a   :  { %266 = vsyncpa [#allocation4], 1 }

</bundles_post_ra>
